<compile_context>
chip_gen: v5e
topology: v5e:2x2
jax: 0.10.0
libtpu: 0.0.40
codegen_flags: <defaults>
</compile_context>

<pallas_src>
import functools

import jax
import jax.numpy as jnp
from jax.experimental import pallas as pl
from jax.experimental.pallas import tpu as pltpu

INPUT_SIZE = 2
HIDDEN_SIZE = 1
OUTPUT_SIZE = 2

LANE = 128                    # lanes per packed row
ELEMS_PER_ROW = LANE // 2     # 64 batch elements per row (2 f32 features each)
ROWS_MAX = 8192               # rows per grid step: 4 MiB in + 4 MiB out of HBM
                              # -> ~16 MiB double-buffered VMEM (fits v5e/v6e/v7x)


def _mlp_kernel(p_ref, x_ref, o_ref):
    """4-layer MLP on one [TR, 128] tile of interleaved (feature-on-lane-parity) data.

    p_ref (SMEM, f32[11]) layout (torch convention W[out, in]):
      0: W_in[0,0]   1: W_in[0,1]   2: b_in[0]
      3: W_fc1[0,0]  4: b_fc1[0]
      5: W_fc2[0,0]  6: b_fc2[0]
      7: W_out[0,0]  8: W_out[1,0]
      9: b_out[0]   10: b_out[1]

    Lane l of a row holds batch element l//2, feature l%2.  The only cross-lane
    interaction in the whole net is the 2-term sum of the first Linear layer;
    it is done with XLU rolls so the VPU sees full 8x128 vregs everywhere.
    """
    x = x_ref[...]                                                   # [TR, 128] f32

    # ---- per-lane constants (shape (1, 128); broadcast along sublanes) ----
    lane = jax.lax.broadcasted_iota(jnp.int32, (1, LANE), 1)         # 0..127
    is_f0 = (lane & 1) == 0                                          # even lane == feature 0

    w_in = jnp.where(is_f0, p_ref[0], p_ref[1])                      # W_in[0,0] / W_in[0,1]
    w_out = jnp.where(is_f0, p_ref[7], p_ref[8])                     # W_out[0,0] / W_out[1,0]
    b_out = jnp.where(is_f0, p_ref[9], p_ref[10])                    # b_out[0]  / b_out[1]

    # Lane-pair partner selection (lane 2m <-> 2m+1), robust to either rotate
    # sign convention: probe which roll direction delivers lane (l +/- 1).
    want = lane + jnp.where(is_f0, 1, -1)                            # partner lane (no wrap)
    src_a = pltpu.roll(lane, shift=1, axis=1)                        # source lane of roll-by-1
    use_a = src_a == want                                            # (1, 128) bool

    # ---- Linear(2 -> 1) + ReLU -------------------------------------------
    y = x * w_in                                                     # per-lane products
    y_a = pltpu.roll(y, shift=1, axis=1)
    y_b = pltpu.roll(y, shift=LANE - 1, axis=1)
    s = y + jnp.where(use_a, y_a, y_b)      # x0*W00 + x1*W01, valid at BOTH lanes of a pair
    h = jnp.maximum(s + p_ref[2], 0.0)

    # ---- Linear(1 -> 1) + ReLU (x2) ---------------------------------------
    h = jnp.maximum(h * p_ref[3] + p_ref[4], 0.0)
    h = jnp.maximum(h * p_ref[5] + p_ref[6], 0.0)

    # ---- Linear(1 -> 2): even lanes -> out feature 0, odd lanes -> feature 1
    o_ref[...] = h * w_out + b_out


def _cdiv(a, b):
    return -(-a // b)


def _round_up(n, m):
    return ((n + m - 1) // m) * m


@jax.jit
def feedforward(x, params):
    """x: f32[B, 2].  params: dict of transposed weights / biases.

    Returns f32[B, 2], matching torch Feedforward.forward semantics exactly.
    """
    B = x.shape[0]

    # Row/tiling arithmetic (all static).  Each row = 64 batch elements.
    rows = max(_cdiv(B, ELEMS_PER_ROW), 1)
    rows8 = _round_up(rows, 8)                       # sublane alignment
    n_steps = _cdiv(rows8, ROWS_MAX)
    tr = _round_up(_cdiv(rows8, n_steps), 8)         # rows per grid step
    rows_pad = tr * n_steps
    b_pad = rows_pad * ELEMS_PER_ROW

    # Pad batch (single fused pad; no-op when already aligned), then a FREE
    # row-major reshape: [b_pad, 2] -> [rows_pad, 128] (no transpose passes).
    x_f32 = x.astype(jnp.float32)
    if b_pad != B:
        x_f32 = jnp.pad(x_f32, ((0, b_pad - B), (0, 0)))
    x_rows = x_f32.reshape(rows_pad, LANE)

    # All weights/biases flattened into one tiny SMEM-resident f32[11].
    p_flat = jnp.concatenate([
        params["w_in_t"].reshape(-1),    # [2]  -> 0, 1
        params["b_in"].reshape(-1),      # [1]  -> 2
        params["w_fc1_t"].reshape(-1),   # [1]  -> 3
        params["b_fc1"].reshape(-1),     # [1]  -> 4
        params["w_fc2_t"].reshape(-1),   # [1]  -> 5
        params["b_fc2"].reshape(-1),     # [1]  -> 6
        params["w_out_t"].reshape(-1),   # [2]  -> 7, 8
        params["b_out"].reshape(-1),     # [2]  -> 9, 10
    ]).astype(jnp.float32)

    out_rows = pl.pallas_call(
        _mlp_kernel,
        out_shape=jax.ShapeDtypeStruct((rows_pad, LANE), jnp.float32),
        grid=(n_steps,),
        in_specs=[
            pl.BlockSpec(memory_space=pltpu.MemorySpace.SMEM),   # params (grid-invariant)
            pl.BlockSpec((tr, LANE), lambda i: (i, 0)),          # lane/sublane-dense tile
        ],
        out_specs=pl.BlockSpec((tr, LANE), lambda i: (i, 0)),
        compiler_params=pltpu.CompilerParams(
            dimension_semantics=("parallel",),                   # megacore splits the grid
            vmem_limit_bytes=32 * 1024 * 1024),
    )(p_flat, x_rows)

    out = out_rows.reshape(b_pad, OUTPUT_SIZE)                   # free reshape back
    return out if b_pad == B else out[:B]


def init_params(key):
    """torch.nn.Linear-style U(-1/sqrt(fan_in), 1/sqrt(fan_in)) init.
    Weights stored transposed as [in, out]."""
    def linear(key, fan_in, fan_out):
        kw, kb = jax.random.split(key)
        bound = 1.0 / jnp.sqrt(jnp.float32(fan_in))
        w_t = jax.random.uniform(kw, (fan_in, fan_out), jnp.float32, -bound, bound)
        b = jax.random.uniform(kb, (fan_out,), jnp.float32, -bound, bound)
        return w_t, b

    k0, k1, k2, k3 = jax.random.split(key, 4)
    w_in_t, b_in = linear(k0, INPUT_SIZE, HIDDEN_SIZE)
    w_fc1_t, b_fc1 = linear(k1, HIDDEN_SIZE, HIDDEN_SIZE)
    w_fc2_t, b_fc2 = linear(k2, HIDDEN_SIZE, HIDDEN_SIZE)
    w_out_t, b_out = linear(k3, HIDDEN_SIZE, OUTPUT_SIZE)
    return dict(w_in_t=w_in_t, b_in=b_in,
                w_fc1_t=w_fc1_t, b_fc1=b_fc1,
                w_fc2_t=w_fc2_t, b_fc2=b_fc2,
                w_out_t=w_out_t, b_out=b_out)


def feedforward_ref(x, p):
    """Pure-JAX reference identical to the torch forward pass."""
    dot = functools.partial(jnp.matmul, precision=jax.lax.Precision.HIGHEST)
    h = jnp.maximum(dot(x, p["w_in_t"]) + p["b_in"], 0.0)
    h = jnp.maximum(dot(h, p["w_fc1_t"]) + p["b_fc1"], 0.0)
    h = jnp.maximum(dot(h, p["w_fc2_t"]) + p["b_fc2"], 0.0)
    return dot(h, p["w_out_t"]) + p["b_out"]


if __name__ == "__main__":
    key = jax.random.PRNGKey(0)
    k_params, k_x1, k_x2 = jax.random.split(key, 3)

    params = init_params(k_params)

    # Small shape consistent with the module: batch=8, features=2.
    x_small = jax.random.normal(k_x1, (8, INPUT_SIZE), jnp.float32)
    out_small = jax.block_until_ready(feedforward(x_small, params))
    ref_small = feedforward_ref(x_small, params)
    assert out_small.shape == (8, OUTPUT_SIZE), out_small.shape
    assert jnp.allclose(out_small, ref_small, atol=1e-5, rtol=1e-5), (out_small, ref_small)

    # Unaligned batch exercises the pad / slice path.
    x_odd = jax.random.normal(k_x2, (300, INPUT_SIZE), jnp.float32)
    out_odd = jax.block_until_ready(feedforward(x_odd, params))
    ref_odd = feedforward_ref(x_odd, params)
    assert out_odd.shape == (300, OUTPUT_SIZE), out_odd.shape
    assert jnp.allclose(out_odd, ref_odd, atol=1e-5, rtol=1e-5), (out_odd, ref_odd)

    print("KERNEL_OK")
</pallas_src>

<mosaic_0001>
module attributes {stable_mosaic.version = 11 : i64} {
  func.func @_mlp_kernel(%arg0: i32, %arg1: memref<11xf32, #tpu.memory_space<smem>>, %arg2: memref<8x128xf32, #tpu.memory_space<vmem>>, %arg3: memref<8x128xf32, #tpu.memory_space<vmem>>) attributes {dimension_semantics = [#tpu.dimension_semantics<parallel>], iteration_bounds = array<i64: 1>, scalar_prefetch = 0 : i64, scratch_operands = 0 : i64, tpu.core_type = #tpu.core_type<tc>, window_params = [{transform_indices = @transform_0, window_bounds = array<i64: 11>}, {transform_indices = @transform_1, window_bounds = array<i64: 8, 128>}, {transform_indices = @transform_2, window_bounds = array<i64: 8, 128>}]} {
    %c0 = arith.constant 0 : index
    %c0_0 = arith.constant 0 : index
    %0 = vector.load %arg2[%c0, %c0_0] : memref<8x128xf32, #tpu.memory_space<vmem>>, vector<8x128xf32>
    %1 = tpu.iota {dimensions = array<i32: 1>} : vector<1x128xi32>
    %c1_i32 = arith.constant 1 : i32
    %2 = vector.broadcast %c1_i32 : i32 to vector<1x128xi32>
    %3 = arith.andi %1, %2 : vector<1x128xi32>
    %c0_i32 = arith.constant 0 : i32
    %4 = vector.broadcast %c0_i32 : i32 to vector<1x128xi32>
    %5 = arith.cmpi eq, %3, %4 : vector<1x128xi32>
    %c0_1 = arith.constant 0 : index
    %6 = memref.load %arg1[%c0_1] : memref<11xf32, #tpu.memory_space<smem>>
    %c1 = arith.constant 1 : index
    %7 = memref.load %arg1[%c1] : memref<11xf32, #tpu.memory_space<smem>>
    %8 = vector.broadcast %6 : f32 to vector<1x128xf32>
    %9 = vector.broadcast %7 : f32 to vector<1x128xf32>
    %10 = arith.select %5, %8, %9 : vector<1x128xi1>, vector<1x128xf32>
    %c7 = arith.constant 7 : index
    %11 = memref.load %arg1[%c7] : memref<11xf32, #tpu.memory_space<smem>>
    %c8 = arith.constant 8 : index
    %12 = memref.load %arg1[%c8] : memref<11xf32, #tpu.memory_space<smem>>
    %13 = vector.broadcast %11 : f32 to vector<1x128xf32>
    %14 = vector.broadcast %12 : f32 to vector<1x128xf32>
    %15 = arith.select %5, %13, %14 : vector<1x128xi1>, vector<1x128xf32>
    %c9 = arith.constant 9 : index
    %16 = memref.load %arg1[%c9] : memref<11xf32, #tpu.memory_space<smem>>
    %c10 = arith.constant 10 : index
    %17 = memref.load %arg1[%c10] : memref<11xf32, #tpu.memory_space<smem>>
    %18 = vector.broadcast %16 : f32 to vector<1x128xf32>
    %19 = vector.broadcast %17 : f32 to vector<1x128xf32>
    %20 = arith.select %5, %18, %19 : vector<1x128xi1>, vector<1x128xf32>
    %c1_i32_2 = arith.constant 1 : i32
    %c-1_i32 = arith.constant -1 : i32
    %21 = vector.broadcast %c1_i32_2 : i32 to vector<1x128xi32>
    %22 = vector.broadcast %c-1_i32 : i32 to vector<1x128xi32>
    %23 = arith.select %5, %21, %22 : vector<1x128xi1>, vector<1x128xi32>
    %24 = arith.addi %1, %23 : vector<1x128xi32>
    %c1_i32_3 = arith.constant 1 : i32
    %25 = tpu.dynamic_rotate %1 by %c1_i32_3 dim 1 : vector<1x128xi32>, i32 -> vector<1x128xi32>
    %26 = arith.cmpi eq, %25, %24 : vector<1x128xi32>
    %27 = vector.broadcast %10 : vector<1x128xf32> to vector<8x128xf32>
    %28 = arith.mulf %0, %27 : vector<8x128xf32>
    %c1_i32_4 = arith.constant 1 : i32
    %29 = tpu.dynamic_rotate %28 by %c1_i32_4 dim 1 : vector<8x128xf32>, i32 -> vector<8x128xf32>
    %c127_i32 = arith.constant 127 : i32
    %30 = tpu.dynamic_rotate %28 by %c127_i32 dim 1 : vector<8x128xf32>, i32 -> vector<8x128xf32>
    %31 = vector.shape_cast %26 : vector<1x128xi1> to vector<1x128xi1>
    %32 = vector.broadcast %31 : vector<1x128xi1> to vector<8x128xi1>
    %33 = arith.select %32, %29, %30 : vector<8x128xi1>, vector<8x128xf32>
    %34 = arith.addf %28, %33 : vector<8x128xf32>
    %c2 = arith.constant 2 : index
    %35 = memref.load %arg1[%c2] : memref<11xf32, #tpu.memory_space<smem>>
    %36 = vector.broadcast %35 : f32 to vector<8x128xf32>
    %37 = arith.addf %34, %36 : vector<8x128xf32>
    %cst = arith.constant 0.000000e+00 : f32
    %38 = vector.broadcast %cst : f32 to vector<8x128xf32>
    %39 = arith.maximumf %37, %38 : vector<8x128xf32>
    %c3 = arith.constant 3 : index
    %40 = memref.load %arg1[%c3] : memref<11xf32, #tpu.memory_space<smem>>
    %41 = vector.broadcast %40 : f32 to vector<8x128xf32>
    %42 = arith.mulf %39, %41 : vector<8x128xf32>
    %c4 = arith.constant 4 : index
    %43 = memref.load %arg1[%c4] : memref<11xf32, #tpu.memory_space<smem>>
    %44 = vector.broadcast %43 : f32 to vector<8x128xf32>
    %45 = arith.addf %42, %44 : vector<8x128xf32>
    %cst_5 = arith.constant 0.000000e+00 : f32
    %46 = vector.broadcast %cst_5 : f32 to vector<8x128xf32>
    %47 = arith.maximumf %45, %46 : vector<8x128xf32>
    %c5 = arith.constant 5 : index
    %48 = memref.load %arg1[%c5] : memref<11xf32, #tpu.memory_space<smem>>
    %49 = vector.broadcast %48 : f32 to vector<8x128xf32>
    %50 = arith.mulf %47, %49 : vector<8x128xf32>
    %c6 = arith.constant 6 : index
    %51 = memref.load %arg1[%c6] : memref<11xf32, #tpu.memory_space<smem>>
    %52 = vector.broadcast %51 : f32 to vector<8x128xf32>
    %53 = arith.addf %50, %52 : vector<8x128xf32>
    %cst_6 = arith.constant 0.000000e+00 : f32
    %54 = vector.broadcast %cst_6 : f32 to vector<8x128xf32>
    %55 = arith.maximumf %53, %54 : vector<8x128xf32>
    %56 = vector.broadcast %15 : vector<1x128xf32> to vector<8x128xf32>
    %57 = arith.mulf %55, %56 : vector<8x128xf32>
    %58 = vector.broadcast %20 : vector<1x128xf32> to vector<8x128xf32>
    %59 = arith.addf %57, %58 : vector<8x128xf32>
    %c0_7 = arith.constant 0 : index
    %c0_8 = arith.constant 0 : index
    %60 = vector.load %arg3[%c0_7, %c0_8] : memref<8x128xf32, #tpu.memory_space<vmem>>, vector<8x128xf32>
    tpu.vector_store %arg3[%c0_7, %c0_8], %59 {strides = array<i32>} : memref<8x128xf32, #tpu.memory_space<vmem>>, vector<8x128xf32>,
    return
  }
  func.func @transform_0(%arg0: i32) -> i32 {
    %c0_i32 = arith.constant 0 : i32
    %c0_i32_0 = arith.constant 0 : i32
    return %c0_i32 : i32
  }
  func.func @transform_1(%arg0: i32) -> (i32, i32) {
    %c0_i32 = arith.constant 0 : i32
    %c0_i32_0 = arith.constant 0 : i32
    return %arg0, %c0_i32 : i32, i32
  }
  func.func @transform_2(%arg0: i32) -> (i32, i32) {
    %c0_i32 = arith.constant 0 : i32
    %c0_i32_0 = arith.constant 0 : i32
    return %arg0, %c0_i32 : i32, i32
  }
}

</mosaic_0001>

<bundles_post_ra>
// kernel: feedforward.1
= control target key start
LH: loop header
LB: loop body
LE: loop exit
PB: predicated region body
PF: predicated region fallthrough
CT: control target
= control target key end

     0   :  { %7 = vsyncpa [#allocation3], 0  ;;  %s114_s12 = smov [#allocation2]   ;;  %s155_s0 = inlined_call_operand.vmem [shape: f32[11], index: 0, kind: input, shape index: {}]   ;;  %s156_s1 = inlined_call_operand.vmem [shape: f32[8,128], index: 1, kind: input, shape index: {}]   ;;  %s157_s2 = inlined_call_operand.vmem [shape: f32[8,128], index: 2, kind: output, shape index: {}]  }
   0x1   :  { %s13_s11 = sshll.u32 %s155_s0, 4  ;;  %s14_s11 = int_to_ptr.vmem [resolvable:$true] %s13_s11 }
   0x2   :  { %16 = dma.vmem_to_smem %s14_s11, 16, %s114_s12, [#allocation3]  }
   0x3   :  { %112 = dma.done.wait [#allocation3], 16  }
   0x4   :  { %113 = vsyncadd [#allocation3], 4294967280 }
   0x5   :  { %23 = sfence }
   0x6   :  { %v25_v0 = vlaneseq  ;;  %s29_s13 = sld [smem:[#allocation2]]  ;;  %s115_s15 = smov 1   ;;  %v24_v3 = vld [vmem:[%s156_s1] sm:$0xff]  ;;  %v117_v9 = vmov 4294967295   ;;  %v118_v13 = vmov 0  }
   0x7   :  { %s85_s14 = sld [smem:[#allocation2 + $0x1]]  ;;  %s116_s0 = smov 127  }
   0x8   :  { %v26_v1 = vand.u32 127, %v25_v0  ;;  %s90_s1 = sld [smem:[#allocation2 + $0x2]] }
   0x9   :  { %s91_s18 = sld [smem:[#allocation2 + $0x3]] }
   0xa   :  { %46 = vrot.lane.b32.xlu0 %v26_v1, %s115_s15  ;;  %v27_v2 = vand.u32 1, %v26_v1  ;;  %s92_s19 = sld [smem:[#allocation2 + $0x4]] }
   0xb   :  { %s93_s20 = sld [smem:[#allocation2 + $0x5]] }
   0xc   :  { %vm140_vm0 = vcmp.eq.s32.totalorder %v27_v2, 0  ;;  %v31_v5 = vstv %s29_s13  ;;  %s86_s21 = sld [smem:[#allocation2 + $0x7]] }
   0xd   :  { %v32_v6 = vstv %s85_s14  ;;  %v44_v10 = vsel %vm140_vm0, 1, %v117_v9  ;;  %s94_s22 = sld [smem:[#allocation2 + $0x6]] }
   0xe   :  { %v33_v7 = vsel %vm140_vm0, %v31_v5, %v32_v6  ;;  %v45_v11 = vadd.s32 %v44_v10, %v26_v1  ;;  %v60_v18 = vstv %s90_s1  ;;  %s87_s23 = sld [smem:[#allocation2 + $0x8]] }
   0xf   :  { %v49_v8 = vmul.f32 %v33_v7, %v24_v3  ;;  %v64_v22 = vstv %s91_s18  ;;  %s88_s24 = sld [smem:[#allocation2 + $0x9]] }
  0x10   :  { %v67_v24 = vstv %s92_s19  ;;  %s89_s25 = sld [smem:[#allocation2 + $0xa]] }
  0x11   :  { %52 = vrot.lane.b32.xlu1 %v49_v8, %s116_s0  ;;  %v71_v27 = vstv %s93_s20 }
  0x12   :  { %50 = vrot.lane.b32.xlu0 %v49_v8, %s115_s15  ;;  %v36_v30 = vstv %s86_s21 }
  0x13   :  { %v74_v29 = vstv %s94_s22 }
  0x14   :  { %v37_v31 = vstv %s87_s23 }
  0x15   :  { %v41_v33 = vstv %s88_s24  ;;  %v38_v36 = vsel %vm140_vm0, %v36_v30, %v37_v31 }
  0x16   :  { %v42_v34 = vstv %s89_s25 }
  0x17   :  { %v43_v38 = vsel %vm140_vm0, %v41_v33, %v42_v34 }
  0x7c   :  { %v47_v12 = vpop.permute.xlu0 %46 }
  0x7d   :  { %vm48_vm1 = vcmp.eq.s32.totalorder %v47_v12, %v45_v11 }
  0x7e   :  { %v54_v14 = vsel %vm48_vm1, 1, %v118_v13 }
  0x7f   :  { %v55_v15 = vperm.slane %v54_v14, 0 }
  0x81   :  { %vm56_vm2 = vcmp.eq.s32.totalorder %v55_v15, 1 }
  0x83   :  { %v53_v16 = vpop.permute.xlu1 %52 }
  0x84   :  { %v51_v17 = vpop.permute.xlu0 %50 }
  0x85   :  { %v57_v19 = vsel %vm56_vm2, %v51_v17, %v53_v16 }
  0x86   :  { %v58_v20 = vadd.f32 %v57_v19, %v49_v8 }
  0x88   :  { %v61_v21 = vadd.f32 %v60_v18, %v58_v20 }
  0x8a   :  { %v62_v23 = vmax.f32 %v61_v21, 0.0 }
  0x8c   :  { %v65_v25 = vmul.f32 %v64_v22, %v62_v23 }
  0x8e   :  { %v68_v26 = vadd.f32 %v67_v24, %v65_v25 }
  0x90   :  { %v69_v28 = vmax.f32 %v68_v26, 0.0 }
  0x92   :  { %v72_v32 = vmul.f32 %v71_v27, %v69_v28 }
  0x94   :  { %v75_v35 = vadd.f32 %v74_v29, %v72_v32 }
  0x96   :  { %v76_v37 = vmax.f32 %v75_v35, 0.0 }
  0x98   :  { %v77_v39 = vmul.f32 %v76_v37, %v38_v36 }
  0x9a   :  { %v78_v40 = vadd.f32 %v77_v39, %v43_v38 }
  0x9c   :  { %79 = vst [vmem:[%s157_s2] sm:$0xff] %v78_v40 }
  0x9d   :  { %84 = vsyncpa [#allocation3], 1 }

</bundles_post_ra>
